<compile_context>
chip_gen: v7x
topology: tpu7x:2x2x1
jax: 0.10.0
libtpu: 0.0.40
codegen_flags: <defaults>
</compile_context>

<pallas_src>
import functools
from typing import NamedTuple

import jax
import jax.numpy as jnp
from jax.experimental import pallas as pl
from jax.experimental.pallas import tpu as pltpu

_MIB = 1024 * 1024


def _round_up(x, m):
    return ((x + m - 1) // m) * m


def _cdiv(a, b):
    return -(-a // b)


def _pick_vmem_limit():
    """VMEM budget: physical capacity minus ~10 MiB Mosaic scratch, capped at 96 MiB
    (96 MiB on v5e/v6e's 128 MiB, ~54 MiB on v7x's 64 MiB per TC)."""
    cap = 128 * _MIB
    try:
        cap = pltpu.get_tpu_info().vmem_capacity_bytes
    except Exception:
        pass
    return int(min(96 * _MIB, cap - 10 * _MIB))


def _pick_tile_m(m, d_pad, requested, vmem_limit, resident_weight_bytes,
                 x_itemsize, out_itemsize, mm_itemsize, pad_d):
    """Largest row tile (multiple of 8, <= requested, <= padded m) whose
    double-buffered I/O tiles + pad scratch + in-kernel f32 intermediates fit the
    VMEM budget left over after the resident weights."""
    tile = min(_round_up(requested, 8), _round_up(m, 8))
    per_row = d_pad * (2 * x_itemsize          # double-buffered input tile
                       + 2 * out_itemsize      # double-buffered output tile
                       + (mm_itemsize if pad_d else 0)  # in-kernel pad scratch
                       + 12)                   # f32 acc + relu + bf16-cast intermediates
    budget = int(0.85 * vmem_limit) - resident_weight_bytes
    while tile > 8 and tile * per_row > budget:
        tile = max(8, _round_up(tile // 2, 8))
    return max(tile, 8)


def _even_grid_steps(m, tile):
    """If there are >= 2 grid steps, prefer an even step count so the 'parallel'
    grid axis splits evenly across v7x's 2 TensorCores (no-op on v5e/v6e)."""
    steps = _cdiv(m, tile)
    if steps >= 2 and steps % 2 == 1:
        cand = max(8, _round_up(_cdiv(m, steps + 1), 8))
        if cand <= tile and _cdiv(m, cand) % 2 == 0:
            return cand
    return tile


class PreparedRFFParams(NamedTuple):
    flat: tuple      # (W1^T, b1, W2^T, b2, W3^T, b3, W4^T, b4), padded + cast
    d: int
    d_pad: int
    mm_dtype: object


def prepare_rff_params(params, *, use_bf16=True):
    """One-time weight prep: zero-pad the feature dim to a multiple of 128 and cast
    weights to the matmul dtype (bf16 by default). Biases stay f32."""
    d = params[0][0].shape[0]
    d_pad = _round_up(d, 128)
    pad_d = d_pad - d
    mm_dtype = jnp.bfloat16 if use_bf16 else jnp.float32
    flat = []
    for wt, bias in params:
        wt32 = jnp.asarray(wt, jnp.float32)
        b32 = jnp.asarray(bias, jnp.float32).reshape(1, -1)
        if pad_d:
            wt32 = jnp.pad(wt32, ((0, pad_d), (0, pad_d)))
            b32 = jnp.pad(b32, ((0, 0), (0, pad_d)))
        flat += [wt32.astype(mm_dtype), b32]
    return PreparedRFFParams(tuple(flat), d, d_pad, mm_dtype)


def _rff_kernel(x_ref,
                w1_ref, b1_ref,
                w2_ref, b2_ref,
                w3_ref, b3_ref,
                w4_ref, b4_ref,
                o_ref, *scratch, mm_dtype, d, pad_d):
    """One row tile of the 4-layer MLP. Matmuls on the MXU (mm_dtype inputs, f32
    accumulation); bias add + ReLU in f32 on the VPU; inter-layer activation kept
    in mm_dtype."""
    if pad_d:
        x_pad = scratch[0]
        x_pad[...] = jnp.zeros_like(x_pad)      # zero pad lanes (avoid NaN from stale VMEM)
        x_pad[:, :d] = x_ref[...]
        h = x_pad[...]
    else:
        h = x_ref[...]

    layers = ((w1_ref, b1_ref), (w2_ref, b2_ref), (w3_ref, b3_ref), (w4_ref, b4_ref))
    for li, (w_ref, b_ref) in enumerate(layers):
        acc = jnp.dot(h, w_ref[...], preferred_element_type=jnp.float32)
        a = jnp.maximum(acc + b_ref[...], 0.0)      # bias broadcast + ReLU (f32, VPU)
        h = a if li == 3 else a.astype(mm_dtype)    # fused cast back to mm_dtype

    if pad_d:
        h = h[:, :d]
    o_ref[...] = h.astype(o_ref.dtype)


def rff_forward(x, params, *, tile_m=None, use_bf16=True, out_dtype=None,
                vmem_limit_bytes=None):
    """x: [b, n, d] float.  params: list of 4 (W^T [d,d], b [d] or [1,d]) tuples,
    or a PreparedRFFParams from prepare_rff_params()."""
    b, n, d = x.shape
    m = b * n

    if isinstance(params, PreparedRFFParams):
        prep = params
    else:
        prep = prepare_rff_params(params, use_bf16=use_bf16)
    assert prep.d == d, "param feature dim does not match input"
    mm_dtype = prep.mm_dtype
    d_pad = prep.d_pad
    pad_d = d_pad - d
    out_dtype = x.dtype if out_dtype is None else out_dtype

    # Activations cross HBM in mm_dtype (bf16 by default): half the input bytes and
    # half the x-tile VMEM; the matmul would truncate to bf16 anyway.
    x2 = x.reshape(m, d).astype(mm_dtype)

    if vmem_limit_bytes is None:
        vmem_limit_bytes = _pick_vmem_limit()

    mm_itemsize = jnp.dtype(mm_dtype).itemsize
    out_itemsize = jnp.dtype(out_dtype).itemsize
    resident_weight_bytes = 4 * (d_pad * d_pad * mm_itemsize + d_pad * 4)

    if tile_m is None:
        # ~4 MiB of activation per buffer amortizes the ~0.35us per-step overhead.
        tile_m = min(4096, max(512, _round_up((4 * _MIB) // (d_pad * mm_itemsize), 8)))

    tile_m_eff = _pick_tile_m(m, d_pad, tile_m, vmem_limit_bytes,
                              resident_weight_bytes, mm_itemsize, out_itemsize,
                              mm_itemsize, pad_d)
    tile_m_eff = _even_grid_steps(m, tile_m_eff)

    grid = (_cdiv(m, tile_m_eff),)

    # x / out use the true feature dim d (full-array last dim -> allowed block shape,
    # masked vst when d % 128 != 0).  Padding to d_pad happens inside the kernel.
    x_spec = pl.BlockSpec((tile_m_eff, d), lambda i: (i, 0))
    o_spec = pl.BlockSpec((tile_m_eff, d), lambda i: (i, 0))
    # Weights/biases never change across the grid -> single-buffer them.
    w_spec = pl.BlockSpec((d_pad, d_pad), lambda i: (0, 0),
                          pipeline_mode=pl.Buffered(1))
    b_spec = pl.BlockSpec((1, d_pad), lambda i: (0, 0),
                          pipeline_mode=pl.Buffered(1))
    in_specs = [x_spec] + [w_spec, b_spec] * 4

    scratch_shapes = []
    if pad_d:
        scratch_shapes.append(pltpu.VMEM((tile_m_eff, d_pad), mm_dtype))

    out = pl.pallas_call(
        functools.partial(_rff_kernel, mm_dtype=mm_dtype, d=d, pad_d=pad_d),
        out_shape=jax.ShapeDtypeStruct((m, d), out_dtype),
        grid_spec=pltpu.PrefetchScalarGridSpec(
            num_scalar_prefetch=0,
            grid=grid,
            in_specs=in_specs,
            out_specs=o_spec,
            scratch_shapes=scratch_shapes),
        compiler_params=pltpu.CompilerParams(
            dimension_semantics=("parallel",),
            vmem_limit_bytes=int(vmem_limit_bytes)),
    )(x2, *prep.flat)

    return out.reshape(b, n, d)


def init_rff_params(key, d):
    """Matches nn.init.kaiming_normal_ (fan_in, gain=sqrt(2)) for weights, zeros for
    biases.  Returns list of (W^T [d,d], b [1,d]) in float32."""
    params = []
    std = (2.0 / d) ** 0.5
    for _ in range(4):
        key, sub = jax.random.split(key)
        w = jax.random.normal(sub, (d, d), dtype=jnp.float32) * std   # [out, in]
        params.append((w.T, jnp.zeros((1, d), dtype=jnp.float32)))
    return params


def rff_reference(x, params):
    """Plain-JAX f32 reference (highest matmul precision) of the same forward."""
    b, n, d = x.shape
    h = x.reshape(b * n, d)
    for wt, bias in params:
        h = jnp.maximum(
            jnp.dot(h, wt, precision=jax.lax.Precision.HIGHEST) + bias, 0.0)
    return h.reshape(b, n, d)


if __name__ == "__main__":
    key = jax.random.PRNGKey(0)
    k_x, k_p, k_x2, k_p2 = jax.random.split(key, 4)

    # Case 1: d NOT a multiple of 128 (in-kernel pad path) and m = 18 not a multiple
    # of the row tile (partial/masked last block).
    b, n, d = 2, 9, 32
    x = jax.random.normal(k_x, (b, n, d), dtype=jnp.float32)
    params = init_rff_params(k_p, d)
    prep = prepare_rff_params(params, use_bf16=True)   # one-time weight prep
    y_ref = rff_reference(x, params)

    y = jax.block_until_ready(rff_forward(x, prep))
    assert y.shape == (b, n, d) and y.dtype == x.dtype
    assert jnp.allclose(y, y_ref, atol=5e-2, rtol=5e-2), "bf16 kernel mismatch"

    # Explicit small tile -> multi-step grid with a partial last block.
    y_t8 = jax.block_until_ready(rff_forward(x, params, tile_m=8))
    assert jnp.allclose(y_t8, y_ref, atol=5e-2, rtol=5e-2), "tile_m=8 mismatch"

    # Full-f32 path for a tighter numerical check.
    y_f32 = jax.block_until_ready(rff_forward(x, params, use_bf16=False))
    assert jnp.allclose(y_f32, y_ref, atol=1e-3, rtol=1e-3), "f32 kernel mismatch"

    # Case 2: d a multiple of 128 (lane-dense, no-pad path), bf16 output writeback.
    b2, n2, d2 = 2, 5, 128
    x_b = jax.random.normal(k_x2, (b2, n2, d2), dtype=jnp.float32)
    params_b = init_rff_params(k_p2, d2)
    y_b_ref = rff_reference(x_b, params_b)
    y_b = jax.block_until_ready(rff_forward(x_b, params_b, out_dtype=jnp.bfloat16))
    assert y_b.shape == (b2, n2, d2) and y_b.dtype == jnp.bfloat16
    assert jnp.allclose(y_b.astype(jnp.float32), y_b_ref, atol=1e-1, rtol=1e-1), \
        "lane-dense bf16-out kernel mismatch"

    print("KERNEL_OK")
</pallas_src>

<mosaic_0001>
module attributes {stable_mosaic.version = 11 : i64} {
  func.func @_rff_kernel(%arg0: i32, %arg1: memref<24x32xbf16, #tpu.memory_space<vmem>>, %arg2: memref<128x128xbf16, #tpu.memory_space<vmem>>, %arg3: memref<1x128xf32, #tpu.memory_space<vmem>>, %arg4: memref<128x128xbf16, #tpu.memory_space<vmem>>, %arg5: memref<1x128xf32, #tpu.memory_space<vmem>>, %arg6: memref<128x128xbf16, #tpu.memory_space<vmem>>, %arg7: memref<1x128xf32, #tpu.memory_space<vmem>>, %arg8: memref<128x128xbf16, #tpu.memory_space<vmem>>, %arg9: memref<1x128xf32, #tpu.memory_space<vmem>>, %arg10: memref<24x32xf32, #tpu.memory_space<vmem>>, %arg11: memref<24x128xbf16, #tpu.memory_space<vmem>>) attributes {dimension_semantics = [#tpu.dimension_semantics<parallel>], iteration_bounds = array<i64: 1>, scalar_prefetch = 0 : i64, scratch_operands = 1 : i64, tpu.core_type = #tpu.core_type<tc>, window_params = [{transform_indices = @transform_0, window_bounds = array<i64: 24, 32>}, {pipeline_mode = #tpu.pipeline_mode<synchronous>, transform_indices = @transform_1, window_bounds = array<i64: 128, 128>}, {pipeline_mode = #tpu.pipeline_mode<synchronous>, transform_indices = @transform_2, window_bounds = array<i64: 1, 128>}, {pipeline_mode = #tpu.pipeline_mode<synchronous>, transform_indices = @transform_3, window_bounds = array<i64: 128, 128>}, {pipeline_mode = #tpu.pipeline_mode<synchronous>, transform_indices = @transform_4, window_bounds = array<i64: 1, 128>}, {pipeline_mode = #tpu.pipeline_mode<synchronous>, transform_indices = @transform_5, window_bounds = array<i64: 128, 128>}, {pipeline_mode = #tpu.pipeline_mode<synchronous>, transform_indices = @transform_6, window_bounds = array<i64: 1, 128>}, {pipeline_mode = #tpu.pipeline_mode<synchronous>, transform_indices = @transform_7, window_bounds = array<i64: 128, 128>}, {pipeline_mode = #tpu.pipeline_mode<synchronous>, transform_indices = @transform_8, window_bounds = array<i64: 1, 128>}, {transform_indices = @transform_9, window_bounds = array<i64: 24, 32>}]} {
    %cst = arith.constant 0.000000e+00 : bf16
    %0 = vector.broadcast %cst : bf16 to vector<24x128xbf16>
    %c0 = arith.constant 0 : index
    %c0_0 = arith.constant 0 : index
    %1 = vector.load %arg11[%c0, %c0_0] : memref<24x128xbf16, #tpu.memory_space<vmem>>, vector<24x128xbf16>
    tpu.vector_store %arg11[%c0, %c0_0], %0 {strides = array<i32>} : memref<24x128xbf16, #tpu.memory_space<vmem>>, vector<24x128xbf16>,
    %c0_1 = arith.constant 0 : index
    %c0_2 = arith.constant 0 : index
    %2 = vector.load %arg1[%c0_1, %c0_2] : memref<24x32xbf16, #tpu.memory_space<vmem>>, vector<24x32xbf16>
    %c0_3 = arith.constant 0 : index
    %c0_4 = arith.constant 0 : index
    %3 = vector.load %arg11[%c0_3, %c0_4] : memref<24x128xbf16, #tpu.memory_space<vmem>>, vector<24x32xbf16>
    tpu.vector_store %arg11[%c0_3, %c0_4], %2 {strides = array<i32>} : memref<24x128xbf16, #tpu.memory_space<vmem>>, vector<24x32xbf16>,
    %c0_5 = arith.constant 0 : index
    %c0_6 = arith.constant 0 : index
    %4 = vector.load %arg11[%c0_5, %c0_6] : memref<24x128xbf16, #tpu.memory_space<vmem>>, vector<24x128xbf16>
    %c0_7 = arith.constant 0 : index
    %c0_8 = arith.constant 0 : index
    %5 = vector.load %arg2[%c0_7, %c0_8] : memref<128x128xbf16, #tpu.memory_space<vmem>>, vector<128x128xbf16>
    %cst_9 = arith.constant dense<0.000000e+00> : vector<24x128xf32>
    %6 = tpu.matmul %4, %5, %cst_9 {dimension_numbers = #tpu.dot_dimension_numbers<[1], [0], [0], [1], [0, 0, 1, 1], [], []>} : vector<24x128xbf16>, vector<128x128xbf16>, vector<24x128xf32> -> vector<24x128xf32>
    %c0_10 = arith.constant 0 : index
    %c0_11 = arith.constant 0 : index
    %7 = vector.load %arg3[%c0_10, %c0_11] : memref<1x128xf32, #tpu.memory_space<vmem>>, vector<1x128xf32>
    %8 = vector.broadcast %7 : vector<1x128xf32> to vector<24x128xf32>
    %9 = arith.addf %6, %8 : vector<24x128xf32>
    %cst_12 = arith.constant 0.000000e+00 : f32
    %10 = vector.broadcast %cst_12 : f32 to vector<24x128xf32>
    %11 = arith.maximumf %9, %10 : vector<24x128xf32>
    %12 = arith.truncf %11 : vector<24x128xf32> to vector<24x128xbf16>
    %c0_13 = arith.constant 0 : index
    %c0_14 = arith.constant 0 : index
    %13 = vector.load %arg4[%c0_13, %c0_14] : memref<128x128xbf16, #tpu.memory_space<vmem>>, vector<128x128xbf16>
    %cst_15 = arith.constant dense<0.000000e+00> : vector<24x128xf32>
    %14 = tpu.matmul %12, %13, %cst_15 {dimension_numbers = #tpu.dot_dimension_numbers<[1], [0], [0], [1], [0, 0, 1, 1], [], []>} : vector<24x128xbf16>, vector<128x128xbf16>, vector<24x128xf32> -> vector<24x128xf32>
    %c0_16 = arith.constant 0 : index
    %c0_17 = arith.constant 0 : index
    %15 = vector.load %arg5[%c0_16, %c0_17] : memref<1x128xf32, #tpu.memory_space<vmem>>, vector<1x128xf32>
    %16 = vector.broadcast %15 : vector<1x128xf32> to vector<24x128xf32>
    %17 = arith.addf %14, %16 : vector<24x128xf32>
    %cst_18 = arith.constant 0.000000e+00 : f32
    %18 = vector.broadcast %cst_18 : f32 to vector<24x128xf32>
    %19 = arith.maximumf %17, %18 : vector<24x128xf32>
    %20 = arith.truncf %19 : vector<24x128xf32> to vector<24x128xbf16>
    %c0_19 = arith.constant 0 : index
    %c0_20 = arith.constant 0 : index
    %21 = vector.load %arg6[%c0_19, %c0_20] : memref<128x128xbf16, #tpu.memory_space<vmem>>, vector<128x128xbf16>
    %cst_21 = arith.constant dense<0.000000e+00> : vector<24x128xf32>
    %22 = tpu.matmul %20, %21, %cst_21 {dimension_numbers = #tpu.dot_dimension_numbers<[1], [0], [0], [1], [0, 0, 1, 1], [], []>} : vector<24x128xbf16>, vector<128x128xbf16>, vector<24x128xf32> -> vector<24x128xf32>
    %c0_22 = arith.constant 0 : index
    %c0_23 = arith.constant 0 : index
    %23 = vector.load %arg7[%c0_22, %c0_23] : memref<1x128xf32, #tpu.memory_space<vmem>>, vector<1x128xf32>
    %24 = vector.broadcast %23 : vector<1x128xf32> to vector<24x128xf32>
    %25 = arith.addf %22, %24 : vector<24x128xf32>
    %cst_24 = arith.constant 0.000000e+00 : f32
    %26 = vector.broadcast %cst_24 : f32 to vector<24x128xf32>
    %27 = arith.maximumf %25, %26 : vector<24x128xf32>
    %28 = arith.truncf %27 : vector<24x128xf32> to vector<24x128xbf16>
    %c0_25 = arith.constant 0 : index
    %c0_26 = arith.constant 0 : index
    %29 = vector.load %arg8[%c0_25, %c0_26] : memref<128x128xbf16, #tpu.memory_space<vmem>>, vector<128x128xbf16>
    %cst_27 = arith.constant dense<0.000000e+00> : vector<24x128xf32>
    %30 = tpu.matmul %28, %29, %cst_27 {dimension_numbers = #tpu.dot_dimension_numbers<[1], [0], [0], [1], [0, 0, 1, 1], [], []>} : vector<24x128xbf16>, vector<128x128xbf16>, vector<24x128xf32> -> vector<24x128xf32>
    %c0_28 = arith.constant 0 : index
    %c0_29 = arith.constant 0 : index
    %31 = vector.load %arg9[%c0_28, %c0_29] : memref<1x128xf32, #tpu.memory_space<vmem>>, vector<1x128xf32>
    %32 = vector.broadcast %31 : vector<1x128xf32> to vector<24x128xf32>
    %33 = arith.addf %30, %32 : vector<24x128xf32>
    %cst_30 = arith.constant 0.000000e+00 : f32
    %34 = vector.broadcast %cst_30 : f32 to vector<24x128xf32>
    %35 = arith.maximumf %33, %34 : vector<24x128xf32>
    %36 = vector.extract_strided_slice %35 {offsets = [0, 0], sizes = [24, 32], strides = [1, 1]} : vector<24x128xf32> to vector<24x32xf32>
    %c0_31 = arith.constant 0 : index
    %c0_32 = arith.constant 0 : index
    %37 = vector.load %arg10[%c0_31, %c0_32] : memref<24x32xf32, #tpu.memory_space<vmem>>, vector<24x32xf32>
    tpu.vector_store %arg10[%c0_31, %c0_32], %36 {strides = array<i32>} : memref<24x32xf32, #tpu.memory_space<vmem>>, vector<24x32xf32>,
    return
  }
  func.func @transform_0(%arg0: i32) -> (i32, i32) {
    %c0_i32 = arith.constant 0 : i32
    %c0_i32_0 = arith.constant 0 : i32
    return %arg0, %c0_i32 : i32, i32
  }
  func.func @transform_1(%arg0: i32) -> (i32, i32) {
    %c0_i32 = arith.constant 0 : i32
    %c0_i32_0 = arith.constant 0 : i32
    %c0_i32_1 = arith.constant 0 : i32
    return %c0_i32, %c0_i32_0 : i32, i32
  }
  func.func @transform_2(%arg0: i32) -> (i32, i32) {
    %c0_i32 = arith.constant 0 : i32
    %c0_i32_0 = arith.constant 0 : i32
    %c0_i32_1 = arith.constant 0 : i32
    return %c0_i32, %c0_i32_0 : i32, i32
  }
  func.func @transform_3(%arg0: i32) -> (i32, i32) {
    %c0_i32 = arith.constant 0 : i32
    %c0_i32_0 = arith.constant 0 : i32
    %c0_i32_1 = arith.constant 0 : i32
    return %c0_i32, %c0_i32_0 : i32, i32
  }
  func.func @transform_4(%arg0: i32) -> (i32, i32) {
    %c0_i32 = arith.constant 0 : i32
    %c0_i32_0 = arith.constant 0 : i32
    %c0_i32_1 = arith.constant 0 : i32
    return %c0_i32, %c0_i32_0 : i32, i32
  }
  func.func @transform_5(%arg0: i32) -> (i32, i32) {
    %c0_i32 = arith.constant 0 : i32
    %c0_i32_0 = arith.constant 0 : i32
    %c0_i32_1 = arith.constant 0 : i32
    return %c0_i32, %c0_i32_0 : i32, i32
  }
  func.func @transform_6(%arg0: i32) -> (i32, i32) {
    %c0_i32 = arith.constant 0 : i32
    %c0_i32_0 = arith.constant 0 : i32
    %c0_i32_1 = arith.constant 0 : i32
    return %c0_i32, %c0_i32_0 : i32, i32
  }
  func.func @transform_7(%arg0: i32) -> (i32, i32) {
    %c0_i32 = arith.constant 0 : i32
    %c0_i32_0 = arith.constant 0 : i32
    %c0_i32_1 = arith.constant 0 : i32
    return %c0_i32, %c0_i32_0 : i32, i32
  }
  func.func @transform_8(%arg0: i32) -> (i32, i32) {
    %c0_i32 = arith.constant 0 : i32
    %c0_i32_0 = arith.constant 0 : i32
    %c0_i32_1 = arith.constant 0 : i32
    return %c0_i32, %c0_i32_0 : i32, i32
  }
  func.func @transform_9(%arg0: i32) -> (i32, i32) {
    %c0_i32 = arith.constant 0 : i32
    %c0_i32_0 = arith.constant 0 : i32
    return %arg0, %c0_i32 : i32, i32
  }
}

</mosaic_0001>

<bundles_post_ra>
// kernel: tpu_custom_call.1
= control target key start
LH: loop header
LB: loop body
LE: loop exit
PB: predicated region body
PF: predicated region fallthrough
CT: control target
= control target key end

     0   :  { %14 = vsyncpa [#allocation4], 0  ;;  %s1343_s0 = inlined_call_operand.hbm [shape: bf16[18,32], index: 0, kind: input, shape index: {}]   ;;  %s1344_s1 = inlined_call_operand.hbm [shape: bf16[128,128], index: 1, kind: input, shape index: {}]   ;;  %s1345_s2 = inlined_call_operand.hbm [shape: f32[1,128], index: 2, kind: input, shape index: {}]   ;;  %s1346_s3 = inlined_call_operand.hbm [shape: bf16[128,128], index: 3, kind: input, shape index: {}]   ;;  %s1347_s4 = inlined_call_operand.hbm [shape: f32[1,128], index: 4, kind: input, shape index: {}]   ;;  %s1348_s5 = inlined_call_operand.hbm [shape: bf16[128,128], index: 5, kind: input, shape index: {}]   ;;  %s1349_s6 = inlined_call_operand.hbm [shape: f32[1,128], index: 6, kind: input, shape index: {}]   ;;  %s1350_s7 = inlined_call_operand.hbm [shape: bf16[128,128], index: 7, kind: input, shape index: {}]   ;;  %s1351_s8 = inlined_call_operand.hbm [shape: f32[1,128], index: 8, kind: input, shape index: {}]   ;;  %s1352_s9 = inlined_call_operand.hbm [shape: f32[18,32], index: 9, kind: output, shape index: {}]  }
   0x1   :  { %15 = vsyncpa [#allocation7], 0 }
   0x2   :  { %16 = vsyncpa [#allocation10], 0 }
   0x3   :  { %17 = vsyncpa [#allocation13], 0 }
   0x4   :  { %18 = vsyncpa [#allocation16], 0 }
   0x5   :  { %19 = vsyncpa [#allocation5], 0  ;;  %s1129_s30 = smov [#allocation6]   ;;  %s1130_s11 = smov [#allocation9]  }
   0x6   :  { %s37_s10 = sshll.u32 %s1129_s30, 4  ;;  %s59_s12 = sshll.u32 %s1130_s11, 4  ;;  %s38_s10 = int_to_ptr.vmem [resolvable:$true] %s37_s10  ;;  %s1194_s12 = int_to_ptr.vmem [resolvable:$true] %s59_s12 }
   0x7   :  { %s897_s15 = scalar_lea.hbm %s1344_s1, 1024 }
   0x8   :  { %p898_p0 = scmp.ne.s32.totalorder %s1344_s1, %s897_s15  ;;  %p901_p1 = scmp.lt.u32.totalorder %s897_s15, %s1344_s1 }
   0xa   :  { %p903_p2 = pnand %p901_p1, %p898_p0 }
   0xc   :  { %906 = shalt.err (!%p903_p2)
}
   0xd   :  { %s907_s20 = scalar_lea.vmem %s38_s10, 1024  ;;  %p912_p4 = scmp.lt.s32.totalorder %s38_s10, %s38_s10 }
   0xe   :  { %p908_p3 = scmp.ne.s32.totalorder %s38_s10, %s907_s20  ;;  %p913_p5 = scmp.lt.s32.totalorder %s907_s20, %s907_s20 }
  0x10   :  { %p914_p6 = por %p913_p5, %p912_p4 }
  0x12   :  { %p915_p7 = pnand %p914_p6, %p908_p3 }
  0x14   :  { %918 = shalt.err (!%p915_p7)
}
  0x15   :  { %s1131_s21 = smov 64   ;;  %s1132_s22 = smov 4  }
  0x16   :  { %43 = dma.hbm_to_vmem [thread:$0]  %s1344_s1, 1024, %s38_s10, [#allocation7], %s1131_s21, %s1131_s21, %s1132_s22  }
  0x17   :  { %s919_s27 = scalar_lea.hbm %s1346_s3, 1024 }
  0x18   :  { %p920_p8 = scmp.ne.s32.totalorder %s1346_s3, %s919_s27  ;;  %p923_p9 = scmp.lt.u32.totalorder %s919_s27, %s1346_s3 }
  0x1a   :  { %p925_p10 = pnand %p923_p9, %p920_p8 }
  0x1c   :  { %928 = shalt.err (!%p925_p10)
}
  0x1d   :  { %s929_s13 = scalar_lea.vmem %s1194_s12, 1024  ;;  %p934_p12 = scmp.lt.s32.totalorder %s1194_s12, %s1194_s12 }
  0x1e   :  { %p930_p11 = scmp.ne.s32.totalorder %s1194_s12, %s929_s13  ;;  %p935_p13 = scmp.lt.s32.totalorder %s929_s13, %s929_s13 }
  0x20   :  { %p936_p0 = por %p935_p13, %p934_p12 }
  0x22   :  { %p937_p1 = pnand %p936_p0, %p930_p11 }
  0x24   :  { %940 = shalt.err (!%p937_p1)
}
  0x25   :  { %65 = dma.hbm_to_vmem [thread:$0]  %s1346_s3, 1024, %s1194_s12, [#allocation10], %s1131_s21, %s1131_s21, %s1132_s22  }
  0x26   :  { %s1133_s14 = smov [#allocation12]   ;;  %s1134_s16 = smov [#allocation15]  }
  0x27   :  { %s81_s15 = sshll.u32 %s1133_s14, 4  ;;  %s103_s17 = sshll.u32 %s1134_s16, 4  ;;  %s82_s15 = int_to_ptr.vmem [resolvable:$true] %s81_s15  ;;  %s1231_s17 = int_to_ptr.vmem [resolvable:$true] %s103_s17 }
  0x28   :  { %s941_s20 = scalar_lea.hbm %s1348_s5, 1024 }
  0x29   :  { %p942_p2 = scmp.ne.s32.totalorder %s1348_s5, %s941_s20  ;;  %p945_p3 = scmp.lt.u32.totalorder %s941_s20, %s1348_s5 }
  0x2b   :  { %p947_p4 = pnand %p945_p3, %p942_p2 }
  0x2d   :  { %950 = shalt.err (!%p947_p4)
}
  0x2e   :  { %s951_s3 = scalar_lea.vmem %s82_s15, 1024  ;;  %p956_p6 = scmp.lt.s32.totalorder %s82_s15, %s82_s15 }
  0x2f   :  { %p952_p5 = scmp.ne.s32.totalorder %s82_s15, %s951_s3  ;;  %p957_p7 = scmp.lt.s32.totalorder %s951_s3, %s951_s3 }
  0x31   :  { %p958_p8 = por %p957_p7, %p956_p6 }
  0x33   :  { %p959_p9 = pnand %p958_p8, %p952_p5 }
  0x35   :  { %962 = shalt.err (!%p959_p9)
}
  0x36   :  { %87 = dma.hbm_to_vmem [thread:$0]  %s1348_s5, 1024, %s82_s15, [#allocation13], %s1131_s21, %s1131_s21, %s1132_s22  }
  0x37   :  { %s963_s30 = scalar_lea.hbm %s1350_s7, 1024 }
  0x38   :  { %p964_p10 = scmp.ne.s32.totalorder %s1350_s7, %s963_s30  ;;  %p967_p11 = scmp.lt.u32.totalorder %s963_s30, %s1350_s7 }
  0x3a   :  { %p969_p12 = pnand %p967_p11, %p964_p10 }
  0x3c   :  { %972 = shalt.err (!%p969_p12)
}
  0x3d   :  { %s973_s14 = scalar_lea.vmem %s1231_s17, 1024  ;;  %p978_p0 = scmp.lt.s32.totalorder %s1231_s17, %s1231_s17 }
  0x3e   :  { %p974_p13 = scmp.ne.s32.totalorder %s1231_s17, %s973_s14  ;;  %p979_p1 = scmp.lt.s32.totalorder %s973_s14, %s973_s14 }
  0x40   :  { %p980_p2 = por %p979_p1, %p978_p0 }
  0x42   :  { %p981_p3 = pnand %p980_p2, %p974_p13 }
  0x44   :  { %984 = shalt.err (!%p981_p3)
}
  0x45   :  { %109 = dma.hbm_to_vmem [thread:$0]  %s1350_s7, 1024, %s1231_s17, [#allocation16], %s1131_s21, %s1131_s21, %s1132_s22  }
  0x46   :  { %s1135_s16 = smov [#allocation3]   ;;  %s1136_s19 = smov [#allocation8]  }
  0x47   :  { %s25_s18 = sshll.u32 %s1135_s16, 4  ;;  %s50_s20 = sshll.u32 %s1136_s19, 4  ;;  %s26_s18 = int_to_ptr.vmem [resolvable:$true] %s25_s18  ;;  %s51_s20 = int_to_ptr.vmem [resolvable:$true] %s50_s20 }
  0x48   :  { %s985_s25 = scalar_lea.hbm %s1343_s0, 192 }
  0x49   :  { %p986_p4 = scmp.ne.s32.totalorder %s1343_s0, %s985_s25  ;;  %p989_p5 = scmp.lt.u32.totalorder %s985_s25, %s1343_s0 }
  0x4b   :  { %p991_p6 = pnand %p989_p5, %p986_p4 }
  0x4d   :  { %994 = shalt.err (!%p991_p6)
}
  0x4e   :  { %s995_s7 = scalar_lea.vmem %s26_s18, 192  ;;  %p1000_p8 = scmp.lt.s32.totalorder %s26_s18, %s26_s18 }
  0x4f   :  { %p996_p7 = scmp.ne.s32.totalorder %s26_s18, %s995_s7  ;;  %p1001_p9 = scmp.lt.s32.totalorder %s995_s7, %s995_s7 }
  0x51   :  { %p1002_p10 = por %p1001_p9, %p1000_p8 }
  0x53   :  { %p1003_p11 = pnand %p1002_p10, %p996_p7 }
  0x55   :  { %1006 = shalt.err (!%p1003_p11)
}
  0x56   :  { %31 = dma.hbm_to_vmem [thread:$0]  %s1343_s0, 192, %s26_s18, [#allocation4], %s1131_s21, %s1131_s21, %s1132_s22  }
  0x57   :  { %s1007_s11 = scalar_lea.hbm %s1345_s2, 16 }
  0x58   :  { %p1008_p12 = scmp.ne.s32.totalorder %s1345_s2, %s1007_s11  ;;  %p1011_p13 = scmp.lt.u32.totalorder %s1007_s11, %s1345_s2 }
  0x5a   :  { %p1013_p0 = pnand %p1011_p13, %p1008_p12 }
  0x5c   :  { %1016 = shalt.err (!%p1013_p0)
}
  0x5d   :  { %s1017_s5 = scalar_lea.vmem %s51_s20, 16  ;;  %s1021_s15 = scalar_lea.vmem %s51_s20, 32 }
  0x5e   :  { %p1018_p1 = scmp.ne.s32.totalorder %s51_s20, %s1017_s5  ;;  %p1022_p2 = scmp.lt.s32.totalorder %s51_s20, %s51_s20 }
  0x5f   :  { %p1023_p3 = scmp.lt.s32.totalorder %s1021_s15, %s1017_s5 }
  0x61   :  { %p1024_p4 = por %p1023_p3, %p1022_p2 }
  0x63   :  { %p1025_p5 = pnand %p1024_p4, %p1018_p1 }
  0x65   :  { %1028 = shalt.err (!%p1025_p5)
}
  0x66   :  { %53 = dma.hbm_to_vmem [thread:$0]  %s1345_s2, 16, %s51_s20, [#allocation7]  }
  0x67   :  { %s1137_s22 = smov [#allocation11]   ;;  %s1138_s18 = smov [#allocation14]  }
  0x68   :  { %s72_s16 = sshll.u32 %s1137_s22, 4  ;;  %s94_s19 = sshll.u32 %s1138_s18, 4  ;;  %s73_s16 = int_to_ptr.vmem [resolvable:$true] %s72_s16  ;;  %s95_s19 = int_to_ptr.vmem [resolvable:$true] %s94_s19 }
  0x69   :  { %s1029_s25 = scalar_lea.hbm %s1347_s4, 16 }
  0x6a   :  { %p1030_p6 = scmp.ne.s32.totalorder %s1347_s4, %s1029_s25  ;;  %p1033_p7 = scmp.lt.u32.totalorder %s1029_s25, %s1347_s4 }
  0x6c   :  { %p1035_p8 = pnand %p1033_p7, %p1030_p6 }
  0x6e   :  { %1038 = shalt.err (!%p1035_p8)
}
  0x6f   :  { %s1039_s2 = scalar_lea.vmem %s73_s16, 16  ;;  %s1043_s20 = scalar_lea.vmem %s73_s16, 32 }
  0x70   :  { %p1040_p9 = scmp.ne.s32.totalorder %s73_s16, %s1039_s2  ;;  %p1044_p10 = scmp.lt.s32.totalorder %s73_s16, %s73_s16 }
  0x71   :  { %p1045_p11 = scmp.lt.s32.totalorder %s1043_s20, %s1039_s2 }
  0x73   :  { %p1046_p12 = por %p1045_p11, %p1044_p10 }
  0x75   :  { %p1047_p13 = pnand %p1046_p12, %p1040_p9 }
  0x77   :  { %1050 = shalt.err (!%p1047_p13)
}
  0x78   :  { %75 = dma.hbm_to_vmem [thread:$0]  %s1347_s4, 16, %s73_s16, [#allocation10]  }
  0x79   :  { %s1051_s30 = scalar_lea.hbm %s1349_s6, 16 }
  0x7a   :  { %p1052_p0 = scmp.ne.s32.totalorder %s1349_s6, %s1051_s30  ;;  %p1055_p1 = scmp.lt.u32.totalorder %s1051_s30, %s1349_s6 }
  0x7c   :  { %p1057_p2 = pnand %p1055_p1, %p1052_p0 }
  0x7e   :  { %1060 = shalt.err (!%p1057_p2)
}
  0x7f   :  { %s1061_s14 = scalar_lea.vmem %s95_s19, 16  ;;  %s1065_s5 = scalar_lea.vmem %s95_s19, 32 }
  0x80   :  { %p1062_p3 = scmp.ne.s32.totalorder %s95_s19, %s1061_s14  ;;  %p1066_p4 = scmp.lt.s32.totalorder %s95_s19, %s95_s19 }
  0x81   :  { %p1067_p5 = scmp.lt.s32.totalorder %s1065_s5, %s1061_s14 }
  0x83   :  { %p1068_p6 = por %p1067_p5, %p1066_p4 }
  0x85   :  { %p1069_p7 = pnand %p1068_p6, %p1062_p3 }
  0x87   :  { %1072 = shalt.err (!%p1069_p7)
}
  0x88   :  { %97 = dma.hbm_to_vmem [thread:$0]  %s1349_s6, 16, %s95_s19, [#allocation13]  }
  0x89   :  { %s1139_s0 = smov [#allocation17]   ;;  %s1073_s18 = scalar_lea.hbm %s1351_s8, 16 }
  0x8a   :  { %s116_s21 = sshll.u32 %s1139_s0, 4  ;;  %p1074_p8 = scmp.ne.s32.totalorder %s1351_s8, %s1073_s18  ;;  %s117_s21 = int_to_ptr.vmem [resolvable:$true] %s116_s21 }
  0x8b   :  { %p1077_p9 = scmp.lt.u32.totalorder %s1073_s18, %s1351_s8 }
  0x8d   :  { %p1079_p10 = pnand %p1077_p9, %p1074_p8 }
  0x8f   :  { %1082 = shalt.err (!%p1079_p10)
}
  0x90   :  { %s1083_s3 = scalar_lea.vmem %s117_s21, 16  ;;  %s1087_s6 = scalar_lea.vmem %s117_s21, 32 }
  0x91   :  { %p1084_p11 = scmp.ne.s32.totalorder %s117_s21, %s1083_s3  ;;  %p1088_p12 = scmp.lt.s32.totalorder %s117_s21, %s117_s21 }
  0x92   :  { %p1089_p13 = scmp.lt.s32.totalorder %s1087_s6, %s1083_s3 }
  0x94   :  { %p1090_p0 = por %p1089_p13, %p1088_p12 }
  0x96   :  { %p1091_p1 = pnand %p1090_p0, %p1084_p11 }
  0x98   :  { %1094 = shalt.err (!%p1091_p1)
}
  0x99   :  { %119 = dma.hbm_to_vmem [thread:$0]  %s1351_s8, 16, %s117_s21, [#allocation16]  }
  0x9a   :  { %1117 = dma.done.wait [#allocation4], 192  }
  0x9b   :  { %1118 = vsyncadd [#allocation4], 4294967104 }
  0x9c   :  { %1119 = dma.done.wait [#allocation7], 1040  }
  0x9d   :  { %1120 = vsyncadd [#allocation7], 4294966256 }
  0x9e   :  { %1121 = dma.done.wait [#allocation10], 1040  }
  0x9f   :  { %1122 = vsyncadd [#allocation10], 4294966256 }
  0xa0   :  { %1123 = dma.done.wait [#allocation13], 1040  }
  0xa1   :  { %1124 = vsyncadd [#allocation13], 4294966256 }
  0xa2   :  { %1125 = dma.done.wait [#allocation16], 1040  }
  0xa3   :  { %1126 = vsyncadd [#allocation16], 4294966256  ;;  %v1140_v0 = vmov 0   ;;  %v863_v1 = vld [vmem:[#allocation6] sm:$0xff]   ;;  %v864_v2 = vld [vmem:[#allocation6 + $0x8] sm:$0xff]   ;;  %vm154_vm0 = vcmask 257024  }
  0xa4   :  { %148 = vst [vmem:[#allocation2] sm:$0xf] %v1140_v0  ;;  %149 = vst [vmem:[#allocation2 + $0x4] sm:$0xf] %v1140_v0  ;;  %768 = vmatprep.subr.bf16.mxu0 %v863_v1  ;;  %v865_v3 = vld [vmem:[#allocation6 + $0x10] sm:$0xff]   ;;  %v866_v4 = vld [vmem:[#allocation6 + $0x18] sm:$0xff]  }
  0xa5   :  { %150 = vst [vmem:[#allocation2 + $0x8] sm:$0xf] %v1140_v0  ;;  %769 = vmatpush3.bf16.msra.mxu0 %v863_v1  ;;  %v151_v5 = vld [vmem:[#allocation3] sm:$0xf]  ;;  %v152_v6 = vld [vmem:[#allocation3 + $0x4] sm:$0xf] }
  0xa6   :  { %770 = vmatprep.subr.bf16.mxu0 %v864_v2  ;;  %v153_v7 = vld [vmem:[#allocation3 + $0x8] sm:$0xf]  ;;  %155 = vst.msk [vmem:[#allocation2] sm:$0xf] %vm154_vm0, %v151_v5  ;;  %156 = vst.msk [vmem:[#allocation2 + $0x4] sm:$0xf] %vm154_vm0, %v152_v6 }
  0xa7   :  { %157 = vst.msk [vmem:[#allocation2 + $0x8] sm:$0xf] %vm154_vm0, %v153_v7  ;;  %v873_v8 = vld [vmem:[#allocation9] sm:$0xff]   ;;  %v874_v9 = vld [vmem:[#allocation9 + $0x8] sm:$0xff]   ;;  %v875_v11 = vld [vmem:[#allocation9 + $0x10] sm:$0xff]   ;;  %vm665_vm1 = vcmask 261120  }
  0xa8   :  { %788 = vmatprep.subr.bf16.mxu1 %v873_v8  ;;  %v867_v10 = vld [vmem:[#allocation6 + $0x20] sm:$0xff]   ;;  %v868_v12 = vld [vmem:[#allocation6 + $0x28] sm:$0xff]   ;;  %v869_v15 = vld [vmem:[#allocation6 + $0x30] sm:$0xff]   ;;  %s1141_s8 = smov [#allocation18]  }
  0xa9   :  { %771 = vmatpush3.bf16.msra.mxu0 %v864_v2  ;;  %789 = vmatpush3.bf16.msra.mxu1 %v873_v8  ;;  %v876_v14 = vld [vmem:[#allocation9 + $0x18] sm:$0xff]   ;;  %v877_v16 = vld [vmem:[#allocation9 + $0x20] sm:$0xff]   ;;  %v878_v18 = vld [vmem:[#allocation9 + $0x28] sm:$0xff]   ;;  %s674_s27 = sshll.u32 %s1141_s8, 4  ;;  %s675_s27 = int_to_ptr.vmem [resolvable:$true] %s674_s27 }
  0xaa   :  { %772 = vmatprep.subr.bf16.mxu0 %v865_v3  ;;  %790 = vmatprep.subr.bf16.mxu1 %v874_v9  ;;  %v870_v17 = vld [vmem:[#allocation6 + $0x38] sm:$0xff]   ;;  %v881_v22 = vld [vmem:[#allocation12] sm:$0xff]   ;;  %v882_v23 = vld [vmem:[#allocation12 + $0x8] sm:$0xff]   ;;  %s1095_s2 = scalar_lea.vmem %s675_s27, 384  ;;  %p1100_p3 = scmp.lt.s32.totalorder %s675_s27, %s675_s27 }
  0xab   :  { %v879_v20 = vld [vmem:[#allocation9 + $0x30] sm:$0xff]   ;;  %v880_v21 = vld [vmem:[#allocation9 + $0x38] sm:$0xff]   ;;  %v885_v26 = vld [vmem:[#allocation12 + $0x20] sm:$0xff]   ;;  %p1096_p2 = scmp.ne.s32.totalorder %s675_s27, %s1095_s2  ;;  %p1101_p4 = scmp.lt.s32.totalorder %s1095_s2, %s1095_s2 }
  0xac   :  { %v883_v24 = vld [vmem:[#allocation12 + $0x10] sm:$0xff]   ;;  %v884_v25 = vld [vmem:[#allocation12 + $0x18] sm:$0xff]   ;;  %v886_v27 = vld [vmem:[#allocation12 + $0x28] sm:$0xff]  }
  0xad   :  { %773 = vmatpush3.bf16.msra.mxu0 %v865_v3  ;;  %v871_v13 = vld [vmem:[#allocation2] sm:$0xff]   ;;  %791 = vmatpush3.bf16.msra.mxu1 %v874_v9  ;;  %v690_v28 = vld [vmem:[#allocation8] ss:$0 sm:$0xff]  ;;  %v887_v41 = vld [vmem:[#allocation12 + $0x30] sm:$0xff]   ;;  %p1102_p5 = por %p1101_p4, %p1100_p3 }
  0xae   :  { %774 = vmatprep.subr.bf16.mxu0 %v866_v4  ;;  %792 = vmatprep.subr.bf16.mxu1 %v875_v11  ;;  %v872_v19 = vld [vmem:[#allocation2 + $0x8] ss:$0 sps:$4 sm:$0xff]   ;;  %v888_v42 = vld [vmem:[#allocation12 + $0x38] sm:$0xff]   ;;  %v889_v43 = vld [vmem:[#allocation15] sm:$0xff]  }
  0xaf   :  { %784 = vmatprep.mubr.bf16.mxu0 %v871_v13  ;;  %v890_v44 = vld [vmem:[#allocation15 + $0x8] sm:$0xff]   ;;  %v891_v45 = vld [vmem:[#allocation15 + $0x10] sm:$0xff]   ;;  %v892_v46 = vld [vmem:[#allocation15 + $0x18] sm:$0xff]   ;;  %p1103_p6 = pnand %p1102_p5, %p1096_p2 }
  0xb0   :  { %v893_v47 = vld [vmem:[#allocation15 + $0x20] sm:$0xff]   ;;  %v894_v48 = vld [vmem:[#allocation15 + $0x28] sm:$0xff]   ;;  %v701_v49 = vld [vmem:[#allocation11] ss:$0 sm:$0xff] }
  0xb1   :  { %775 = vmatpush3.bf16.msra.mxu0 %v866_v4  ;;  %793 = vmatpush3.bf16.msra.mxu1 %v875_v11  ;;  %v895_v62 = vld [vmem:[#allocation15 + $0x30] sm:$0xff]   ;;  %v896_v63 = vld [vmem:[#allocation15 + $0x38] sm:$0xff]   ;;  %v719_v13 = vld [vmem:[#allocation17] ss:$0 sm:$0xff] }
  0xb2   :  { %776 = vmatprep.subr.bf16.mxu0 %v867_v10  ;;  %794 = vmatprep.subr.bf16.mxu1 %v876_v14  ;;  %v710_v0 = vld [vmem:[#allocation14] ss:$0 sm:$0xff] }
  0xb5   :  { %777 = vmatpush3.bf16.msra.mxu0 %v867_v10  ;;  %795 = vmatpush3.bf16.msra.mxu1 %v876_v14 }
  0xb6   :  { %778 = vmatprep.subr.bf16.mxu0 %v868_v12  ;;  %796 = vmatprep.subr.bf16.mxu1 %v877_v16 }
  0xb9   :  { %779 = vmatpush3.bf16.msra.mxu0 %v868_v12  ;;  %797 = vmatpush3.bf16.msra.mxu1 %v877_v16 }
  0xba   :  { %780 = vmatprep.subr.bf16.mxu0 %v869_v15  ;;  %798 = vmatprep.subr.bf16.mxu1 %v878_v18 }
  0xbd   :  { %781 = vmatpush3.bf16.msra.mxu0 %v869_v15  ;;  %799 = vmatpush3.bf16.msra.mxu1 %v878_v18 }
  0xbe   :  { %782 = vmatprep.subr.bf16.mxu0 %v870_v17  ;;  %800 = vmatprep.subr.bf16.mxu1 %v879_v20 }
  0xc1   :  { %783 = vmatpush3.bf16.msra.mxu0 %v870_v17  ;;  %801 = vmatpush3.bf16.msra.mxu1 %v879_v20 }
  0xc2   :  { %802 = vmatprep.subr.bf16.mxu1 %v880_v21  ;;  %808 = vmatprep.subr.bf16.mxu0 %v881_v22 }
  0xc4   :  { %785 = vmatmul.mubr.bf16.vlgmr.msra.gmra.mrb[0].mxu0 %v872_v19 }
  0xc5   :  { %803 = vmatpush3.bf16.msra.mxu1 %v880_v21  ;;  %809 = vmatpush3.bf16.msra.mxu0 %v881_v22 }
  0xc6   :  { %810 = vmatprep.subr.bf16.mxu0 %v882_v23  ;;  %828 = vmatprep.subr.bf16.mxu1 %v889_v43 }
  0xc9   :  { %811 = vmatpush3.bf16.msra.mxu0 %v882_v23 }
  0xca   :  { %812 = vmatprep.subr.bf16.mxu0 %v883_v24 }
  0xcd   :  { %813 = vmatpush3.bf16.msra.mxu0 %v883_v24 }
  0xce   :  { %814 = vmatprep.subr.bf16.mxu0 %v884_v25 }
  0xd1   :  { %815 = vmatpush3.bf16.msra.mxu0 %v884_v25 }
  0xd2   :  { %816 = vmatprep.subr.bf16.mxu0 %v885_v26 }
  0xd5   :  { %817 = vmatpush3.bf16.msra.mxu0 %v885_v26 }
  0xd6   :  { %818 = vmatprep.subr.bf16.mxu0 %v886_v27 }
  0xd9   :  { %819 = vmatpush3.bf16.msra.mxu0 %v886_v27 }
  0xda   :  { %820 = vmatprep.subr.bf16.mxu0 %v887_v41 }
  0xdd   :  { %821 = vmatpush3.bf16.msra.mxu0 %v887_v41 }
  0xde   :  { %822 = vmatprep.subr.bf16.mxu0 %v888_v42 }
  0xe1   :  { %823 = vmatpush3.bf16.msra.mxu0 %v888_v42 }
 0x197   :  { %v786_v29 = vpop.f32.mrb[0].mxu0 }
 0x198   :  { %v285_v30 = vadd.f32 %v786_v29, %v690_v28  ;;  %v276_v31 = vpop.f32.mrb[1].mxu0 }
 0x199   :  { %v277_v32 = vadd.f32 %v690_v28, %v276_v31  ;;  %v787_v33 = vpop.f32.mrb[2].mxu0 }
 0x19a   :  { %v279_v34 = vpop.f32.mrb[3].mxu0  ;;  %v292_v36 = vmax.f32 %v285_v30, 0.0 }
 0x19b   :  { %v280_v35 = vadd.f32 %v690_v28, %v279_v34  ;;  %v290_v37 = vmax.f32 %v277_v32, 0.0 }
 0x19c   :  { %v294_v40 = vpack.c.bf16 %v292_v36, %v292_v36 }
 0x19d   :  { %v291_v38 = vmax.f32 %v280_v35, 0.0 }
 0x19f   :  { %v293_v39 = vpack.c.bf16 %v291_v38, %v290_v37 }
 0x1a1   :  { %804 = vmatprep.mubr.bf16.mxu1 %v293_v39 }
 0x1a2   :  { %805 = vmatmul.mubr.bf16.vlgmr.msra.gmra.mrb[0].mxu1 %v294_v40 }
 0x1a3   :  { %829 = vmatpush3.bf16.msra.mxu1 %v889_v43 }
 0x1a4   :  { %830 = vmatprep.subr.bf16.mxu1 %v890_v44 }
 0x1a7   :  { %831 = vmatpush3.bf16.msra.mxu1 %v890_v44 }
 0x1a8   :  { %832 = vmatprep.subr.bf16.mxu1 %v891_v45 }
 0x1ab   :  { %833 = vmatpush3.bf16.msra.mxu1 %v891_v45 }
 0x1ac   :  { %834 = vmatprep.subr.bf16.mxu1 %v892_v46 }
 0x1af   :  { %835 = vmatpush3.bf16.msra.mxu1 %v892_v46 }
 0x1b0   :  { %836 = vmatprep.subr.bf16.mxu1 %v893_v47 }
 0x1b3   :  { %837 = vmatpush3.bf16.msra.mxu1 %v893_v47 }
 0x1b4   :  { %838 = vmatprep.subr.bf16.mxu1 %v894_v48 }
 0x1b7   :  { %839 = vmatpush3.bf16.msra.mxu1 %v894_v48 }
 0x1b8   :  { %840 = vmatprep.subr.bf16.mxu1 %v895_v62 }
 0x1bb   :  { %841 = vmatpush3.bf16.msra.mxu1 %v895_v62 }
 0x1bc   :  { %842 = vmatprep.subr.bf16.mxu1 %v896_v63 }
 0x1bf   :  { %843 = vmatpush3.bf16.msra.mxu1 %v896_v63 }
 0x275   :  { %v806_v50 = vpop.f32.mrb[0].mxu1 }
 0x276   :  { %v409_v51 = vadd.f32 %v806_v50, %v701_v49  ;;  %v400_v52 = vpop.f32.mrb[1].mxu1 }
 0x277   :  { %v401_v53 = vadd.f32 %v701_v49, %v400_v52  ;;  %v807_v54 = vpop.f32.mrb[2].mxu1 }
 0x278   :  { %v403_v55 = vpop.f32.mrb[3].mxu1  ;;  %v416_v57 = vmax.f32 %v409_v51, 0.0 }
 0x279   :  { %v404_v56 = vadd.f32 %v701_v49, %v403_v55  ;;  %v414_v58 = vmax.f32 %v401_v53, 0.0 }
 0x27a   :  { %v418_v61 = vpack.c.bf16 %v416_v57, %v416_v57 }
 0x27b   :  { %v415_v59 = vmax.f32 %v404_v56, 0.0 }
 0x27d   :  { %v417_v60 = vpack.c.bf16 %v415_v59, %v414_v58 }
 0x27f   :  { %824 = vmatprep.mubr.bf16.mxu0 %v417_v60 }
 0x280   :  { %825 = vmatmul.mubr.bf16.vlgmr.msra.gmra.mrb[4].mxu0 %v418_v61 }
 0x353   :  { %v826_v1 = vpop.f32.mrb[4].mxu0 }
 0x354   :  { %v533_v2 = vadd.f32 %v826_v1, %v710_v0  ;;  %v524_v3 = vpop.f32.mrb[5].mxu0 }
 0x355   :  { %v525_v4 = vadd.f32 %v710_v0, %v524_v3  ;;  %v827_v5 = vpop.f32.mrb[6].mxu0 }
 0x356   :  { %v527_v6 = vpop.f32.mrb[7].mxu0  ;;  %v540_v8 = vmax.f32 %v533_v2, 0.0 }
 0x357   :  { %v528_v7 = vadd.f32 %v710_v0, %v527_v6  ;;  %v538_v9 = vmax.f32 %v525_v4, 0.0 }
 0x358   :  { %v542_v12 = vpack.c.bf16 %v540_v8, %v540_v8 }
 0x359   :  { %v539_v10 = vmax.f32 %v528_v7, 0.0 }
 0x35b   :  { %v541_v11 = vpack.c.bf16 %v539_v10, %v538_v9 }
 0x35d   :  { %844 = vmatprep.mubr.bf16.mxu1 %v541_v11 }
 0x35e   :  { %845 = vmatmul.mubr.bf16.vlgmr.msra.gmra.mrb[4].mxu1 %v542_v12 }
 0x431   :  { %v846_v14 = vpop.f32.mrb[4].mxu1 }
 0x432   :  { %v657_v15 = vadd.f32 %v846_v14, %v719_v13  ;;  %v648_v16 = vpop.f32.mrb[5].mxu1 }
 0x433   :  { %v649_v17 = vadd.f32 %v719_v13, %v648_v16  ;;  %v847_v18 = vpop.f32.mrb[6].mxu1 }
 0x434   :  { %v664_v19 = vmax.f32 %v657_v15, 0.0  ;;  %v651_v20 = vpop.f32.mrb[7].mxu1 }
 0x435   :  { %v662_v21 = vmax.f32 %v649_v17, 0.0  ;;  %v652_v22 = vadd.f32 %v719_v13, %v651_v20 }
 0x436   :  { %668 = vst.msk [vmem:[#allocation18 + $0x10] sm:$0xff] %vm665_vm1, %v664_v19 }
 0x437   :  { %666 = vst.msk [vmem:[#allocation18] sm:$0xff] %vm665_vm1, %v662_v21  ;;  %v663_v23 = vmax.f32 %v652_v22, 0.0 }
 0x439   :  { %667 = vst.msk [vmem:[#allocation18 + $0x8] sm:$0xff] %vm665_vm1, %v663_v23 }
 0x43a   :  { %1106 = shalt.err (!%p1103_p6)
}
 0x43b   :  { %s1107_s17 = scalar_lea.hbm %s1352_s9, 384 }
 0x43c   :  { %p1108_p7 = scmp.ne.s32.totalorder %s1352_s9, %s1107_s17  ;;  %p1111_p8 = scmp.lt.u32.totalorder %s1107_s17, %s1352_s9 }
 0x43e   :  { %p1113_p9 = pnand %p1111_p8, %p1108_p7 }
 0x440   :  { %1116 = shalt.err (!%p1113_p9)
}
 0x441   :  { %s1142_s13 = smov 128   ;;  %s1143_s1 = smov 8  }
 0x442   :  { %680 = dma.vmem_to_hbm [thread:$0]  %s675_s27, 384, %s1352_s9, [#allocation5], %s1142_s13, %s1142_s13, %s1143_s1  }
 0x443   :  { %1127 = dma.done.wait [#allocation5], 384  }
 0x444   :  { %1128 = vsyncadd [#allocation5], 4294966912 }
 0x445   :  { %684 = vsyncpa [#allocation4], 1 }
 0x446   :  { %685 = vsyncpa [#allocation7], 1 }
 0x447   :  { %686 = vsyncpa [#allocation10], 1 }
 0x448   :  { %687 = vsyncpa [#allocation13], 1 }
 0x449   :  { %688 = vsyncpa [#allocation16], 1 }
 0x44a   :  { %689 = vsyncpa [#allocation5], 1 }

</bundles_post_ra>
